<compile_context>
chip_gen: v5e
topology: v5e:2x2
jax: 0.10.0
libtpu: 0.0.40
codegen_flags: <defaults>
</compile_context>

<pallas_src>
import functools

import jax
import jax.numpy as jnp
from jax import lax
from jax.experimental import pallas as pl
from jax.experimental.pallas import tpu as pltpu


def _fism_kernel(ur_idx_ref,      # SMEM  (B_pad*L,) int32   -- scalar prefetch
                 items_emb_ref,   # VMEM  (TB, E)    f32      -- gathered item rows (batch tile)
                 ur_table_ref,    # VMEM  (num_items+1, E) f32 -- resident ratings table
                 out_ref,         # VMEM  (TB, 1)    f32
                 ur_sum_ref,      # VMEM scratch (TB, E) f32
                 *, L):
    TB = items_emb_ref.shape[0]
    E = items_emb_ref.shape[1]
    inv_l = 1.0 / L
    base = pl.program_id(0) * (TB * L)

    # Per batch row: gather + accumulate the L ratings-embedding rows.
    @pl.loop(0, TB)
    def _(b):
        row_base = base + b * L

        def accumulate(l, acc):
            idx = ur_idx_ref[row_base + l]                     # SMEM scalar load
            return acc + ur_table_ref[pl.ds(idx, 1), :]        # dynamic (1, E) VMEM row load

        acc = lax.fori_loop(0, L, accumulate,
                            jnp.zeros((1, E), jnp.float32), unroll=True)
        ur_sum_ref[pl.ds(b, 1), :] = acc

    # inference = (1/L) * sum_E( sum_L(table[idx]) * items_emb )  -- scale after the reduce.
    out_ref[...] = (jnp.sum(ur_sum_ref[...] * items_emb_ref[...],
                            axis=1, keepdims=True) * inv_l).astype(out_ref.dtype)


def fism_old_forward(users, items, users_ratings, items_ratings, params, reg):
    """JAX/Pallas port of FISM_Old.forward. `users` / `items_ratings` are accepted
    but unused, exactly as in the PyTorch reference."""
    del users, items_ratings  # not referenced by FISM_Old.forward

    items_table = params['items_emb']          # (num_items, E)
    ur_table = params['users_ratings_emb']     # (num_items+1, E), row 0 is the padding row
    num_items, E = items_table.shape
    B, L = users_ratings.shape
    f32 = jnp.float32

    # ---- plain-JAX glue: item-row gather + regularizer (tiny, O(B*E)) -------
    items_embedding = jnp.take(items_table, items, axis=0)              # (B, E)
    regs = reg * jnp.sqrt(jnp.sum(items_embedding * items_embedding))   # torch.norm (Frobenius)

    # ---- batch tiling (VMEM footprint is independent of TB now) -------------
    if B >= 512:
        TB = 512
    elif B >= 256:
        TB = 256
    else:
        TB = 8                                   # small-batch / test path
    B_pad = pl.cdiv(B, TB) * TB
    pad_b = B_pad - B

    items_emb_p = jnp.pad(items_embedding, ((0, pad_b), (0, 0)))         # (B_pad, E)
    ur_idx = jnp.pad(users_ratings.astype(jnp.int32),
                     ((0, pad_b), (0, 0))).reshape(-1)                   # (B_pad*L,) padding idx = 0

    # ---- per-generation VMEM budget -----------------------------------------
    try:
        vmem_cap = int(pltpu.get_tpu_info().vmem_capacity_bytes)
    except Exception:
        vmem_cap = 64 * 1024 * 1024              # conservative (v7x) fallback
    vmem_limit = max(16 * 1024 * 1024,
                     min(int(0.8 * vmem_cap), 100 * 1024 * 1024))

    cost = pl.CostEstimate(
        flops=2 * B_pad * L * E + 3 * B_pad * E,
        transcendentals=0,
        bytes_accessed=4 * (ur_table.size + items_emb_p.size + ur_idx.size + B_pad),
    )

    kernel = functools.partial(_fism_kernel, L=L)

    def _build(table_pipeline_mode):
        table_spec_kwargs = {}
        if table_pipeline_mode is not None:
            table_spec_kwargs['pipeline_mode'] = table_pipeline_mode
        return pl.pallas_call(
            kernel,
            out_shape=jax.ShapeDtypeStruct((B_pad, 1), f32),
            grid_spec=pltpu.PrefetchScalarGridSpec(
                num_scalar_prefetch=1,
                grid=(B_pad // TB,),
                in_specs=[
                    # gathered item rows, one batch tile per grid step
                    pl.BlockSpec((TB, E), lambda i, idx: (i, 0)),
                    # ratings-embedding table, resident across the whole grid
                    pl.BlockSpec((num_items + 1, E), lambda i, idx: (0, 0),
                                 **table_spec_kwargs),
                ],
                out_specs=pl.BlockSpec((TB, 1), lambda i, idx: (i, 0)),
                scratch_shapes=[pltpu.VMEM((TB, E), f32)],
            ),
            compiler_params=pltpu.CompilerParams(
                dimension_semantics=("parallel",),     # batch tiles shard across TCs (v7x)
                vmem_limit_bytes=vmem_limit,
            ),
            cost_estimate=cost,
        )

    # Prefer a single-buffered resident table (constant index_map -> never
    # re-fetched); fall back to the default double-buffered spec if
    # pipeline_mode=pl.Buffered(1) is not supported by this backend.
    try:
        out = jax.block_until_ready(
            _build(pl.Buffered(1))(ur_idx, items_emb_p, ur_table))
    except Exception:
        out = jax.block_until_ready(
            _build(None)(ur_idx, items_emb_p, ur_table))

    W4 = 1.0  # self._W4 = 1
    inferences = W4 * out[:B]                    # (B, 1)
    return inferences, regs


def reference_forward(items, users_ratings, params, reg):
    # Pure-JAX transcription of the PyTorch forward, for correctness checking.
    items_emb = jnp.take(params['items_emb'], items, axis=0)                # (B, E)
    ur_emb = jnp.take(params['users_ratings_emb'], users_ratings, axis=0)   # (B, L, E)
    ur_mean = jnp.mean(ur_emb, axis=1)                                      # (B, E)
    out4 = ur_mean * items_emb
    inference = jnp.sum(out4, axis=1, keepdims=True)                        # _W4 == 1
    regs = reg * jnp.sqrt(jnp.sum(items_emb * items_emb))
    return inference, regs


if __name__ == "__main__":
    num_users, num_items, E, B, L = 12, 10, 32, 16, 5
    reg = 0.01

    key = jax.random.PRNGKey(0)
    ks = jax.random.split(key, 8)
    f32 = jnp.float32

    users_ratings_emb = jax.random.normal(ks[2], (num_items + 1, E), f32) * 0.5
    users_ratings_emb = users_ratings_emb.at[0].set(0.0)     # padding_idx=0
    items_ratings_emb = jax.random.normal(ks[3], (num_users + 1, E), f32) * 0.5
    items_ratings_emb = items_ratings_emb.at[0].set(0.0)     # padding_idx=0 (unused in forward)

    params = {
        'users_emb': jax.random.normal(ks[0], (num_users, E), f32) * 0.5,   # unused in forward
        'items_emb': jax.random.normal(ks[1], (num_items, E), f32) * 0.5,
        'users_ratings_emb': users_ratings_emb,
        'items_ratings_emb': items_ratings_emb,                             # unused in forward
    }

    users = jax.random.randint(ks[4], (B,), 0, num_users)                   # unused in forward
    items = jax.random.randint(ks[5], (B,), 0, num_items)
    users_ratings = jax.random.randint(ks[6], (B, L), 0, num_items + 1)     # 0 == padding
    items_ratings = jax.random.randint(ks[7], (B, L), 0, num_users + 1)     # unused in forward

    inferences, regs = fism_old_forward(
        users, items, users_ratings, items_ratings, params, reg)
    inferences = jax.block_until_ready(inferences)

    exp_inf, exp_regs = reference_forward(items, users_ratings, params, reg)
    assert inferences.shape == (B, 1)
    assert jnp.allclose(inferences, exp_inf, rtol=1e-4, atol=1e-4), (
        "inference mismatch vs pure-JAX reference")
    assert jnp.allclose(regs, exp_regs, rtol=1e-5, atol=1e-6), (
        "regs mismatch vs pure-JAX reference")

    print("KERNEL_OK")
</pallas_src>

<mosaic_0001>
module attributes {stable_mosaic.version = 11 : i64} {
  func.func @_fism_kernel(%arg0: i32, %arg1: memref<80xi32, #tpu.memory_space<smem>>, %arg2: memref<8x32xf32, #tpu.memory_space<vmem>>, %arg3: memref<11x32xf32, #tpu.memory_space<vmem>>, %arg4: memref<8x1xf32, #tpu.memory_space<vmem>>, %arg5: memref<8x32xf32, #tpu.memory_space<vmem>>) attributes {dimension_semantics = [#tpu.dimension_semantics<parallel>], iteration_bounds = array<i64: 2>, scalar_prefetch = 1 : i64, scratch_operands = 1 : i64, tpu.core_type = #tpu.core_type<tc>, window_params = [{transform_indices = @transform_0, window_bounds = array<i64: 8, 32>}, {pipeline_mode = #tpu.pipeline_mode<synchronous>, transform_indices = @transform_1, window_bounds = array<i64: 11, 32>}, {transform_indices = @transform_2, window_bounds = array<i64: 8, 1>}]} {
    %c40_i32 = arith.constant 40 : i32
    %0 = arith.muli %arg0, %c40_i32 : i32
    %c0_i32 = arith.constant 0 : i32
    %c8_i32 = arith.constant 8 : i32
    %1 = arith.addi %c0_i32, %c8_i32 : i32
    %c1_i32 = arith.constant 1 : i32
    scf.for %arg6 = %c0_i32 to %1 step %c1_i32  : i32 {
      %c1_i32_7 = arith.constant 1 : i32
      %10 = arith.muli %arg6, %c1_i32_7 : i32
      %c0_i32_8 = arith.constant 0 : i32
      %11 = arith.addi %c0_i32_8, %10 : i32
      %c5_i32 = arith.constant 5 : i32
      %12 = arith.muli %11, %c5_i32 : i32
      %13 = arith.addi %0, %12 : i32
      %cst_9 = arith.constant 0.000000e+00 : f32
      %14 = vector.broadcast %cst_9 : f32 to vector<1x32xf32>
      %c0_i32_10 = arith.constant 0 : i32
      %15 = arith.addi %13, %c0_i32_10 : i32
      %16 = arith.index_cast %15 : i32 to index
      %17 = memref.load %arg1[%16] : memref<80xi32, #tpu.memory_space<smem>>
      %18 = arith.index_cast %17 : i32 to index
      %c0_11 = arith.constant 0 : index
      %19 = vector.load %arg3[%18, %c0_11] : memref<11x32xf32, #tpu.memory_space<vmem>>, vector<1x32xf32>
      %20 = arith.addf %14, %19 : vector<1x32xf32>
      %c1_i32_12 = arith.constant 1 : i32
      %21 = arith.addi %13, %c1_i32_12 : i32
      %22 = arith.index_cast %21 : i32 to index
      %23 = memref.load %arg1[%22] : memref<80xi32, #tpu.memory_space<smem>>
      %24 = arith.index_cast %23 : i32 to index
      %c0_13 = arith.constant 0 : index
      %25 = vector.load %arg3[%24, %c0_13] : memref<11x32xf32, #tpu.memory_space<vmem>>, vector<1x32xf32>
      %26 = arith.addf %20, %25 : vector<1x32xf32>
      %c2_i32 = arith.constant 2 : i32
      %27 = arith.addi %13, %c2_i32 : i32
      %28 = arith.index_cast %27 : i32 to index
      %29 = memref.load %arg1[%28] : memref<80xi32, #tpu.memory_space<smem>>
      %30 = arith.index_cast %29 : i32 to index
      %c0_14 = arith.constant 0 : index
      %31 = vector.load %arg3[%30, %c0_14] : memref<11x32xf32, #tpu.memory_space<vmem>>, vector<1x32xf32>
      %32 = arith.addf %26, %31 : vector<1x32xf32>
      %c3_i32 = arith.constant 3 : i32
      %33 = arith.addi %13, %c3_i32 : i32
      %34 = arith.index_cast %33 : i32 to index
      %35 = memref.load %arg1[%34] : memref<80xi32, #tpu.memory_space<smem>>
      %36 = arith.index_cast %35 : i32 to index
      %c0_15 = arith.constant 0 : index
      %37 = vector.load %arg3[%36, %c0_15] : memref<11x32xf32, #tpu.memory_space<vmem>>, vector<1x32xf32>
      %38 = arith.addf %32, %37 : vector<1x32xf32>
      %c4_i32 = arith.constant 4 : i32
      %39 = arith.addi %13, %c4_i32 : i32
      %40 = arith.index_cast %39 : i32 to index
      %41 = memref.load %arg1[%40] : memref<80xi32, #tpu.memory_space<smem>>
      %42 = arith.index_cast %41 : i32 to index
      %c0_16 = arith.constant 0 : index
      %43 = vector.load %arg3[%42, %c0_16] : memref<11x32xf32, #tpu.memory_space<vmem>>, vector<1x32xf32>
      %44 = arith.addf %38, %43 : vector<1x32xf32>
      %c5_i32_17 = arith.constant 5 : i32
      %45 = arith.index_cast %11 : i32 to index
      %c0_18 = arith.constant 0 : index
      %46 = vector.load %arg5[%45, %c0_18] : memref<8x32xf32, #tpu.memory_space<vmem>>, vector<1x32xf32>
      tpu.vector_store %arg5[%45, %c0_18], %44 {strides = array<i32>} : memref<8x32xf32, #tpu.memory_space<vmem>>, vector<1x32xf32>,
    }
    %c8_i32_0 = arith.constant 8 : i32
    %c0 = arith.constant 0 : index
    %c0_1 = arith.constant 0 : index
    %2 = vector.load %arg5[%c0, %c0_1] : memref<8x32xf32, #tpu.memory_space<vmem>>, vector<8x32xf32>
    %c0_2 = arith.constant 0 : index
    %c0_3 = arith.constant 0 : index
    %3 = vector.load %arg2[%c0_2, %c0_3] : memref<8x32xf32, #tpu.memory_space<vmem>>, vector<8x32xf32>
    %4 = arith.mulf %2, %3 : vector<8x32xf32>
    %cst = arith.constant dense<0.000000e+00> : vector<8xf32>
    %5 = vector.multi_reduction <add>, %4, %cst [1] : vector<8x32xf32> to vector<8xf32>
    %6 = vector.shape_cast %5 : vector<8xf32> to vector<8x1xf32>
    %cst_4 = arith.constant 2.000000e-01 : f32
    %7 = vector.broadcast %cst_4 : f32 to vector<8x1xf32>
    %8 = arith.mulf %6, %7 : vector<8x1xf32>
    %c0_5 = arith.constant 0 : index
    %c0_6 = arith.constant 0 : index
    %9 = vector.load %arg4[%c0_5, %c0_6] : memref<8x1xf32, #tpu.memory_space<vmem>>, vector<8x1xf32>
    tpu.vector_store %arg4[%c0_5, %c0_6], %8 {strides = array<i32>} : memref<8x1xf32, #tpu.memory_space<vmem>>, vector<8x1xf32>,
    return
  }
  func.func @transform_0(%arg0: i32, %arg1: memref<80xi32, #tpu.memory_space<smem>>) -> (i32, i32) {
    %c0_i32 = arith.constant 0 : i32
    %c0_i32_0 = arith.constant 0 : i32
    return %arg0, %c0_i32 : i32, i32
  }
  func.func @transform_1(%arg0: i32, %arg1: memref<80xi32, #tpu.memory_space<smem>>) -> (i32, i32) {
    %c0_i32 = arith.constant 0 : i32
    %c0_i32_0 = arith.constant 0 : i32
    %c0_i32_1 = arith.constant 0 : i32
    return %c0_i32, %c0_i32_0 : i32, i32
  }
  func.func @transform_2(%arg0: i32, %arg1: memref<80xi32, #tpu.memory_space<smem>>) -> (i32, i32) {
    %c0_i32 = arith.constant 0 : i32
    %c0_i32_0 = arith.constant 0 : i32
    return %arg0, %c0_i32 : i32, i32
  }
}

module attributes {stable_mosaic.version = 11 : i64} {
  func.func @_fism_kernel(%arg0: i32, %arg1: memref<80xi32, #tpu.memory_space<smem>>, %arg2: memref<8x32xf32, #tpu.memory_space<vmem>>, %arg3: memref<11x32xf32, #tpu.memory_space<vmem>>, %arg4: memref<8x1xf32, #tpu.memory_space<vmem>>, %arg5: memref<8x32xf32, #tpu.memory_space<vmem>>) attributes {dimension_semantics = [#tpu.dimension_semantics<parallel>], iteration_bounds = array<i64: 2>, scalar_prefetch = 1 : i64, scratch_operands = 1 : i64, tpu.core_type = #tpu.core_type<tc>, window_params = [{transform_indices = @transform_0, window_bounds = array<i64: 8, 32>}, {pipeline_mode = #tpu.pipeline_mode<synchronous>, transform_indices = @transform_1, window_bounds = array<i64: 11, 32>}, {transform_indices = @transform_2, window_bounds = array<i64: 8, 1>}]} {
    %c40_i32 = arith.constant 40 : i32
    %0 = arith.muli %arg0, %c40_i32 : i32
    %c0_i32 = arith.constant 0 : i32
    %c8_i32 = arith.constant 8 : i32
    %1 = arith.addi %c0_i32, %c8_i32 : i32
    %c1_i32 = arith.constant 1 : i32
    scf.for %arg6 = %c0_i32 to %1 step %c1_i32  : i32 {
      %c1_i32_7 = arith.constant 1 : i32
      %10 = arith.muli %arg6, %c1_i32_7 : i32
      %c0_i32_8 = arith.constant 0 : i32
      %11 = arith.addi %c0_i32_8, %10 : i32
      %c5_i32 = arith.constant 5 : i32
      %12 = arith.muli %11, %c5_i32 : i32
      %13 = arith.addi %0, %12 : i32
      %cst_9 = arith.constant 0.000000e+00 : f32
      %14 = vector.broadcast %cst_9 : f32 to vector<1x32xf32>
      %c0_i32_10 = arith.constant 0 : i32
      %15 = arith.addi %13, %c0_i32_10 : i32
      %16 = arith.index_cast %15 : i32 to index
      %17 = memref.load %arg1[%16] : memref<80xi32, #tpu.memory_space<smem>>
      %18 = arith.index_cast %17 : i32 to index
      %c0_11 = arith.constant 0 : index
      %19 = vector.load %arg3[%18, %c0_11] : memref<11x32xf32, #tpu.memory_space<vmem>>, vector<1x32xf32>
      %20 = arith.addf %14, %19 : vector<1x32xf32>
      %c1_i32_12 = arith.constant 1 : i32
      %21 = arith.addi %13, %c1_i32_12 : i32
      %22 = arith.index_cast %21 : i32 to index
      %23 = memref.load %arg1[%22] : memref<80xi32, #tpu.memory_space<smem>>
      %24 = arith.index_cast %23 : i32 to index
      %c0_13 = arith.constant 0 : index
      %25 = vector.load %arg3[%24, %c0_13] : memref<11x32xf32, #tpu.memory_space<vmem>>, vector<1x32xf32>
      %26 = arith.addf %20, %25 : vector<1x32xf32>
      %c2_i32 = arith.constant 2 : i32
      %27 = arith.addi %13, %c2_i32 : i32
      %28 = arith.index_cast %27 : i32 to index
      %29 = memref.load %arg1[%28] : memref<80xi32, #tpu.memory_space<smem>>
      %30 = arith.index_cast %29 : i32 to index
      %c0_14 = arith.constant 0 : index
      %31 = vector.load %arg3[%30, %c0_14] : memref<11x32xf32, #tpu.memory_space<vmem>>, vector<1x32xf32>
      %32 = arith.addf %26, %31 : vector<1x32xf32>
      %c3_i32 = arith.constant 3 : i32
      %33 = arith.addi %13, %c3_i32 : i32
      %34 = arith.index_cast %33 : i32 to index
      %35 = memref.load %arg1[%34] : memref<80xi32, #tpu.memory_space<smem>>
      %36 = arith.index_cast %35 : i32 to index
      %c0_15 = arith.constant 0 : index
      %37 = vector.load %arg3[%36, %c0_15] : memref<11x32xf32, #tpu.memory_space<vmem>>, vector<1x32xf32>
      %38 = arith.addf %32, %37 : vector<1x32xf32>
      %c4_i32 = arith.constant 4 : i32
      %39 = arith.addi %13, %c4_i32 : i32
      %40 = arith.index_cast %39 : i32 to index
      %41 = memref.load %arg1[%40] : memref<80xi32, #tpu.memory_space<smem>>
      %42 = arith.index_cast %41 : i32 to index
      %c0_16 = arith.constant 0 : index
      %43 = vector.load %arg3[%42, %c0_16] : memref<11x32xf32, #tpu.memory_space<vmem>>, vector<1x32xf32>
      %44 = arith.addf %38, %43 : vector<1x32xf32>
      %c5_i32_17 = arith.constant 5 : i32
      %45 = arith.index_cast %11 : i32 to index
      %c0_18 = arith.constant 0 : index
      %46 = vector.load %arg5[%45, %c0_18] : memref<8x32xf32, #tpu.memory_space<vmem>>, vector<1x32xf32>
      tpu.vector_store %arg5[%45, %c0_18], %44 {strides = array<i32>} : memref<8x32xf32, #tpu.memory_space<vmem>>, vector<1x32xf32>,
    }
    %c8_i32_0 = arith.constant 8 : i32
    %c0 = arith.constant 0 : index
    %c0_1 = arith.constant 0 : index
    %2 = vector.load %arg5[%c0, %c0_1] : memref<8x32xf32, #tpu.memory_space<vmem>>, vector<8x32xf32>
    %c0_2 = arith.constant 0 : index
    %c0_3 = arith.constant 0 : index
    %3 = vector.load %arg2[%c0_2, %c0_3] : memref<8x32xf32, #tpu.memory_space<vmem>>, vector<8x32xf32>
    %4 = arith.mulf %2, %3 : vector<8x32xf32>
    %cst = arith.constant dense<0.000000e+00> : vector<8xf32>
    %5 = vector.multi_reduction <add>, %4, %cst [1] : vector<8x32xf32> to vector<8xf32>
    %6 = vector.shape_cast %5 : vector<8xf32> to vector<8x1xf32>
    %cst_4 = arith.constant 2.000000e-01 : f32
    %7 = vector.broadcast %cst_4 : f32 to vector<8x1xf32>
    %8 = arith.mulf %6, %7 : vector<8x1xf32>
    %c0_5 = arith.constant 0 : index
    %c0_6 = arith.constant 0 : index
    %9 = vector.load %arg4[%c0_5, %c0_6] : memref<8x1xf32, #tpu.memory_space<vmem>>, vector<8x1xf32>
    tpu.vector_store %arg4[%c0_5, %c0_6], %8 {strides = array<i32>} : memref<8x1xf32, #tpu.memory_space<vmem>>, vector<8x1xf32>,
    return
  }
  func.func @transform_0(%arg0: i32, %arg1: memref<80xi32, #tpu.memory_space<smem>>) -> (i32, i32) {
    %c0_i32 = arith.constant 0 : i32
    %c0_i32_0 = arith.constant 0 : i32
    return %arg0, %c0_i32 : i32, i32
  }
  func.func @transform_1(%arg0: i32, %arg1: memref<80xi32, #tpu.memory_space<smem>>) -> (i32, i32) {
    %c0_i32 = arith.constant 0 : i32
    %c0_i32_0 = arith.constant 0 : i32
    %c0_i32_1 = arith.constant 0 : i32
    return %c0_i32, %c0_i32_0 : i32, i32
  }
  func.func @transform_2(%arg0: i32, %arg1: memref<80xi32, #tpu.memory_space<smem>>) -> (i32, i32) {
    %c0_i32 = arith.constant 0 : i32
    %c0_i32_0 = arith.constant 0 : i32
    return %arg0, %c0_i32 : i32, i32
  }
}

</mosaic_0001>

<bundles_post_ra>
// kernel: tpu_custom_call.1
= control target key start
LH: loop header
LB: loop body
LE: loop exit
PB: predicated region body
PF: predicated region fallthrough
CT: control target
= control target key end

     0   :  { %s514_s15 = smov [#allocation4]   ;;  %s665_s0 = inlined_call_operand.hbm [shape: s32[80], index: 0, kind: input, shape index: {}]   ;;  %s666_s1 = inlined_call_operand.hbm [shape: f32[16,32], index: 1, kind: input, shape index: {}]   ;;  %s667_s2 = inlined_call_operand.hbm [shape: f32[11,32], index: 2, kind: input, shape index: {}]   ;;  %s668_s3 = inlined_call_operand.vmem [shape: f32[16,1], index: 3, kind: output, shape index: {}]  }
   0x1   :  { %s9_s14 = sshll.u32 %s665_s0, 4  ;;  %s10_s14 = int_to_ptr.hbm [resolvable:$true] %s9_s14 }
   0x2   :  { %12 = dma.hbm_to_smem %s10_s14, 16, %s514_s15, [#allocation3] }
   0x3   :  { %484 = dma.done.wait [#allocation3], 16 }
   0x4   :  { %485 = vsyncadd [#allocation3], 4294967280 }
   0x5   :  { %15 = sfence }
   0x6   :  { %16 = vsyncpa [#allocation6], 0 }
   0x7   :  { %18 = vsyncpa [#allocation6 + $0x1], 0 }
   0x8   :  { %19 = vsyncpa [#allocation8], 0  ;;  %s541_s16 = smov 0   ;;  %s543_s17 = smov 0  }
   0x9   :  { %s545_s18 = smov 0   ;;  %s547_s19 = smov 0  }
   0xa LB: > { %s114_s21 = sshll.u32 %s667_s2, 4  ;;  %s563_s22 = sadd.s32 4294967295, %s508_s19   ;;  %s508_s19 = sphi %s547_s19, %s675_s19   ;;  %s504_s18 = sphi %s545_s18, %s674_s18   ;;  %s500_s17 = sphi %s543_s17, %s673_s17   ;;  %s496_s16 = sphi %s541_s16, %s672_s16   ;;  %s115_s21 = int_to_ptr.hbm [resolvable:$true] %s114_s21 }
   0xb   : > { %p320_p0 = scmp.ge.s32.totalorder %s508_s19, 1  ;;  %p46_p1 = scmp.eq.s32.totalorder %s563_s22, 0 }
   0xc   : > { %p103_p2 = scmp.lt.s32.totalorder %s508_s19, 3  ;;  %s515_s24 = smov [#allocation7]  }
   0xd   : > { %s116_s25 = sshll.u32 %s515_s24, 4  ;;  %s516_s26 = smov 128   ;;  %s117_s25 = int_to_ptr.vmem [resolvable:$true] %s116_s25 }
   0xe   : > { %p568_p3 = pnand %p320_p0, %p103_p2  ;;  %s517_s27 = smov 8  }
   0xf   : > { %s577_s28 = sadd.s32 1, %s508_s19   ;;  %s32_s30 = sadd.s32 1, %s504_s18 }
  0x10   : > { %p337_p4 = pneg %p568_p3  ;;  %s29_s29 = ssub.s32 %s508_s19, %s577_s28 }
  0x11   : > { %p30_p6 = scmp.eq.s32.totalorder %s29_s29, 0  ;;  %p39_p7 = scmp.ne.s32.totalorder %s504_s18, %s500_s17 }
  0x12   : > { %p338_p5 = pnand %p337_p4, %p46_p1  ;;  %p40_p8 = scmp.eq.s32.totalorder %s508_s19, 0 }
  0x13   : > { %p45_p9 = scmp.ne.s32.totalorder %s500_s17, %s496_s16  ;;  %p346_p12 = scmp.lt.s32.totalorder %s508_s19, 2 }
  0x14   : > { %340 = dma.hbm_to_vmem [thread:$0]  (!%p338_p5), %s115_s21, 256, %s117_s25, [#allocation8], %s516_s26, %s516_s26, %s517_s27  }
  0x15   : > { %s587_s4 = scalar_select %p30_p6, %s504_s18, %s32_s30  }
  0x16   : > { %p41_p10 = por %p40_p8, %p39_p7  ;;  %p591_p11 = por %p46_p1, %p45_p9 }
  0x17   : > { %s130_s6 = sand.u32 1, %s504_s18   ;;  %s324_s8 = sshll.u32 %s508_s19, 3 }
  0x18   : > { %s323_s7 = sshll.u32 %s130_s6, 3  ;;  %s138_s11 = scalar_lea.hbm %s666_s1, %s324_s8 }
  0x19   : > { %s134_s12 = scalar_lea.vmem [#allocation5], %s323_s7  ;;  %s140_s14 = sshll.u32 %s138_s11, 4  ;;  %s141_s14 = int_to_ptr.hbm [resolvable:$true] %s140_s14 }
  0x1a   : > { %s142_s13 = sshll.u32 %s134_s12, 4  ;;  %p601_p13 = pnand %p346_p12, %p41_p10  ;;  %s143_s13 = int_to_ptr.vmem [resolvable:$true] %s142_s13 }
  0x1b   : > { %s131_s16 = scalar_lea.sflag [#allocation6], %s130_s6  ;;  %s434_s0 = sshra.s32 %s141_s14, 4  ;;  %s435_s0 = int_to_ptr.hbm [resolvable:$true] %s434_s0 }
  0x1c   : > { %s436_s20 = scalar_lea.hbm %s435_s0, 8  ;;  %p438_p2 = pneg %p601_p13 }
  0x1d   : > { %p437_p0 = scmp.ne.s32.totalorder %s435_s0, %s436_s20  ;;  %s441_s24 = scalar_lea.hbm %s666_s1, 16 }
  0x1e   : > { %p442_p6 = scmp.lt.s32.totalorder %s435_s0, %s666_s1  ;;  %p443_p7 = scmp.lt.s32.totalorder %s441_s24, %s436_s20 }
  0x1f   : > { %p439_p4 = pnand %p438_p2, %p437_p0 }
  0x20   : > { %p444_p8 = por %p443_p7, %p442_p6 }
  0x21   : > { %p440_p5 = pneg %p439_p4 }
  0x23   : > { %p445_p9 = pnand %p444_p8, %p440_p5 }
  0x25   : > { %448 = shalt.err (!%p445_p9)
}
  0x26   : > { %344 = dma.hbm_to_vmem [thread:$0]  (!%p601_p13), %s141_s14, 128, %s143_s13, %s131_s16  }
  0x27   : > { %151 = sbr.rel (%p568_p3) target bundleno = 203 (0xcb), region = 28  ;;  %s153_s27 = sand.u32 (!%p568_p3), 1, %s500_s17  }
  0x28   : > { %s618_s29 = sshll.u32 (!%p568_p3), %s153_s27, 3  ;;  %s154_s30 = scalar_lea.sflag (!%p568_p3), [#allocation6], %s153_s27 }
  0x29   : > { %s157_s6 = scalar_lea.vmem (!%p568_p3), [#allocation5], %s618_s29 }
  0x2c   : > { %487 = dma.done.wait (%p591_p11), %s154_s30, 128  }
  0x2d   : > { %489 = vsyncadd (%p591_p11), %s154_s30, 4294967168 }
  0x2e   : > { %491 = dma.done.wait (%p46_p1), [#allocation8], 256  }
  0x2f   : > { %493 = vsyncadd (%p46_p1), [#allocation8], 4294967040  ;;  %p183_p3 = scmp.lt.s32.totalorder %s563_s22, 1  ;;  %s187_s23 = smul.u32 40, %s563_s22 }
  0x30   : > { %s637_s5 = smov 0  }
  0x31   : > { %s184_s7 = scalar_select %p183_p3, %s563_s22, 1 }
  0x33   : > { %s328_s8 = sshll.u32 %s184_s7, 3 }
  0x34   : > { %s635_s11 = scalar_lea.vmem %s668_s3, %s328_s8 }
  0x35 LB: >> { %s194_s12 = smul.u32 5, %s512_s5  ;;  %vm221_vm0 = vcmask 253952   ;;  %s220_s9 = scalar_lea.vmem [#allocation2], %s512_s5  ;;  %s512_s5 = sphi %s637_s5, %s193_s5  }
  0x36   : >> { %s193_s5 = sadd.s32 1, %s512_s5  }
  0x37   : >> { %s195_s13 = sadd.s32 %s194_s12, %s187_s23  ;;  %p190_p1 = scmp.ge.s32.totalorder %s193_s5, 8  }
  0x38   : >> { %s196_s14 = sld [smem:[#allocation4 + %s195_s13]]  ;;  %s200_s15 = sadd.s32 1, %s195_s13  ;;  %v224_v10 = vld [vmem:[%s157_s6] sm:$0xff] (%p190_p1)  ;;  %vm226_vm1 = vcmask (%p190_p1), 261120   ;;  %vm231_vm2 = vcmask (%p190_p1), 7168  }
  0x39   : >> { %s201_s16 = sld [smem:[#allocation4 + %s200_s15]]  ;;  %s205_s0 = sadd.s32 2, %s195_s13 }
  0x3a   : >> { %s206_s20 = sld [smem:[#allocation4 + %s205_s0]]  ;;  %s210_s19 = sadd.s32 3, %s195_s13 }
  0x3b   : >> { %s211_s21 = sld [smem:[#allocation4 + %s210_s19]]  ;;  %s215_s24 = sadd.s32 4, %s195_s13 }
  0x3c   : >> { %s216_s25 = sld [smem:[#allocation4 + %s215_s24]] }
  0x3e   : >> { %s197_s26 = scalar_lea.vmem [#allocation7], %s196_s14 }
  0x3f   : >> { %v198_v0 = vld [vmem:[%s197_s26] sm:$0x1]  ;;  %s202_s27 = scalar_lea.vmem [#allocation7], %s201_s16 }
  0x40   : >> { %v203_v1 = vld [vmem:[%s202_s27] sm:$0x1]  ;;  %s207_s30 = scalar_lea.vmem [#allocation7], %s206_s20 }
  0x41   : >> { %v204_v2 = vadd.f32 %v203_v1, %v198_v0  ;;  %v208_v3 = vld [vmem:[%s207_s30] sm:$0x1]  ;;  %s212_s7 = scalar_lea.vmem [#allocation7], %s211_s21 }
  0x42   : >> { %v213_v4 = vld [vmem:[%s212_s7] sm:$0x1]  ;;  %s217_s8 = scalar_lea.vmem [#allocation7], %s216_s25 }
  0x43   : >> { %v209_v5 = vadd.f32 %v208_v3, %v204_v2  ;;  %v218_v6 = vld [vmem:[%s217_s8] sm:$0x1] }
  0x45   : >> { %v214_v7 = vadd.f32 %v213_v4, %v209_v5  ;;  %192 = sbr.rel (!%p190_p1) target bundleno = 53 (0x35), region = 85 }
  0x47   : >> { %v219_v8 = vadd.f32 %v218_v6, %v214_v7 }
  0x49   : >> { %222 = vst.msk [vmem:[%s220_s9] sm:$0x1] %vm221_vm0, %v219_v8 }
  0x50   : > { %v223_v9 = vld [vmem:[#allocation2] sm:$0xff] }
  0x51   : > { %v225_v11 = vmul.f32 %v224_v10, %v223_v9 }
  0x53   : > { %v227_v12 = vsel %vm226_vm1, %v225_v11, 0.0 }
  0x54   : > { %228 = vadd.xlane.f32.xlu0 %v227_v12 }
  0xc7   : > { %v229_v13 = vpop.xlane.xlu0 %228 }
  0xc8   : > { %v230_v14 = vmul.f32 0.2, %v229_v13 }
  0xca   : > { %232 = vst.msk [vmem:[%s635_s11] sm:$0xff] %vm231_vm2, %v230_v14 }
  0xcb PF: > { %p22_p10 = scmp.ge.s32.totalorder %s577_s28, 4   ;;  %s672_s16 = smov %s500_s17 }
  0xcc   : > { %s673_s17 = smov %s504_s18  ;;  %s674_s18 = smov %s587_s4 }
  0xcd   : > { %s675_s19 = smov %s577_s28  ;;  %24 = sbr.rel (!%p22_p10) target bundleno = 10 (0xa), region = 96 }
  0xd2   :  { %252 = vsyncpa [#allocation6], 1 }
  0xd3   :  { %254 = vsyncpa [#allocation6 + $0x1], 1 }
  0xd4   :  { %255 = vsyncpa [#allocation8], 1 }

// kernel: tpu_custom_call.1
= control target key start
LH: loop header
LB: loop body
LE: loop exit
PB: predicated region body
PF: predicated region fallthrough
CT: control target
= control target key end

     0   :  { %s514_s15 = smov [#allocation4]   ;;  %s665_s0 = inlined_call_operand.hbm [shape: s32[80], index: 0, kind: input, shape index: {}]   ;;  %s666_s1 = inlined_call_operand.hbm [shape: f32[16,32], index: 1, kind: input, shape index: {}]   ;;  %s667_s2 = inlined_call_operand.hbm [shape: f32[11,32], index: 2, kind: input, shape index: {}]   ;;  %s668_s3 = inlined_call_operand.vmem [shape: f32[16,1], index: 3, kind: output, shape index: {}]  }
   0x1   :  { %s9_s14 = sshll.u32 %s665_s0, 4  ;;  %s10_s14 = int_to_ptr.hbm [resolvable:$true] %s9_s14 }
   0x2   :  { %12 = dma.hbm_to_smem %s10_s14, 16, %s514_s15, [#allocation3] }
   0x3   :  { %484 = dma.done.wait [#allocation3], 16 }
   0x4   :  { %485 = vsyncadd [#allocation3], 4294967280 }
   0x5   :  { %15 = sfence }
   0x6   :  { %16 = vsyncpa [#allocation6], 0 }
   0x7   :  { %18 = vsyncpa [#allocation6 + $0x1], 0 }
   0x8   :  { %19 = vsyncpa [#allocation8], 0  ;;  %s541_s16 = smov 0   ;;  %s543_s17 = smov 0  }
   0x9   :  { %s545_s18 = smov 0   ;;  %s547_s19 = smov 0  }
   0xa LB: > { %s114_s21 = sshll.u32 %s667_s2, 4  ;;  %s563_s22 = sadd.s32 4294967295, %s508_s19   ;;  %s508_s19 = sphi %s547_s19, %s675_s19   ;;  %s504_s18 = sphi %s545_s18, %s674_s18   ;;  %s500_s17 = sphi %s543_s17, %s673_s17   ;;  %s496_s16 = sphi %s541_s16, %s672_s16   ;;  %s115_s21 = int_to_ptr.hbm [resolvable:$true] %s114_s21 }
   0xb   : > { %p320_p0 = scmp.ge.s32.totalorder %s508_s19, 1  ;;  %p46_p1 = scmp.eq.s32.totalorder %s563_s22, 0 }
   0xc   : > { %p103_p2 = scmp.lt.s32.totalorder %s508_s19, 3  ;;  %s515_s24 = smov [#allocation7]  }
   0xd   : > { %s116_s25 = sshll.u32 %s515_s24, 4  ;;  %s516_s26 = smov 128   ;;  %s117_s25 = int_to_ptr.vmem [resolvable:$true] %s116_s25 }
   0xe   : > { %p568_p3 = pnand %p320_p0, %p103_p2  ;;  %s517_s27 = smov 8  }
   0xf   : > { %s577_s28 = sadd.s32 1, %s508_s19   ;;  %s32_s30 = sadd.s32 1, %s504_s18 }
  0x10   : > { %p337_p4 = pneg %p568_p3  ;;  %s29_s29 = ssub.s32 %s508_s19, %s577_s28 }
  0x11   : > { %p30_p6 = scmp.eq.s32.totalorder %s29_s29, 0  ;;  %p39_p7 = scmp.ne.s32.totalorder %s504_s18, %s500_s17 }
  0x12   : > { %p338_p5 = pnand %p337_p4, %p46_p1  ;;  %p40_p8 = scmp.eq.s32.totalorder %s508_s19, 0 }
  0x13   : > { %p45_p9 = scmp.ne.s32.totalorder %s500_s17, %s496_s16  ;;  %p346_p12 = scmp.lt.s32.totalorder %s508_s19, 2 }
  0x14   : > { %340 = dma.hbm_to_vmem [thread:$0]  (!%p338_p5), %s115_s21, 256, %s117_s25, [#allocation8], %s516_s26, %s516_s26, %s517_s27  }
  0x15   : > { %s587_s4 = scalar_select %p30_p6, %s504_s18, %s32_s30  }
  0x16   : > { %p41_p10 = por %p40_p8, %p39_p7  ;;  %p591_p11 = por %p46_p1, %p45_p9 }
  0x17   : > { %s130_s6 = sand.u32 1, %s504_s18   ;;  %s324_s8 = sshll.u32 %s508_s19, 3 }
  0x18   : > { %s323_s7 = sshll.u32 %s130_s6, 3  ;;  %s138_s11 = scalar_lea.hbm %s666_s1, %s324_s8 }
  0x19   : > { %s134_s12 = scalar_lea.vmem [#allocation5], %s323_s7  ;;  %s140_s14 = sshll.u32 %s138_s11, 4  ;;  %s141_s14 = int_to_ptr.hbm [resolvable:$true] %s140_s14 }
  0x1a   : > { %s142_s13 = sshll.u32 %s134_s12, 4  ;;  %p601_p13 = pnand %p346_p12, %p41_p10  ;;  %s143_s13 = int_to_ptr.vmem [resolvable:$true] %s142_s13 }
  0x1b   : > { %s131_s16 = scalar_lea.sflag [#allocation6], %s130_s6  ;;  %s434_s0 = sshra.s32 %s141_s14, 4  ;;  %s435_s0 = int_to_ptr.hbm [resolvable:$true] %s434_s0 }
  0x1c   : > { %s436_s20 = scalar_lea.hbm %s435_s0, 8  ;;  %p438_p2 = pneg %p601_p13 }
  0x1d   : > { %p437_p0 = scmp.ne.s32.totalorder %s435_s0, %s436_s20  ;;  %s441_s24 = scalar_lea.hbm %s666_s1, 16 }
  0x1e   : > { %p442_p6 = scmp.lt.s32.totalorder %s435_s0, %s666_s1  ;;  %p443_p7 = scmp.lt.s32.totalorder %s441_s24, %s436_s20 }
  0x1f   : > { %p439_p4 = pnand %p438_p2, %p437_p0 }
  0x20   : > { %p444_p8 = por %p443_p7, %p442_p6 }
  0x21   : > { %p440_p5 = pneg %p439_p4 }
  0x23   : > { %p445_p9 = pnand %p444_p8, %p440_p5 }
  0x25   : > { %448 = shalt.err (!%p445_p9)
}
  0x26   : > { %344 = dma.hbm_to_vmem [thread:$0]  (!%p601_p13), %s141_s14, 128, %s143_s13, %s131_s16  }
  0x27   : > { %151 = sbr.rel (%p568_p3) target bundleno = 203 (0xcb), region = 28  ;;  %s153_s27 = sand.u32 (!%p568_p3), 1, %s500_s17  }
  0x28   : > { %s618_s29 = sshll.u32 (!%p568_p3), %s153_s27, 3  ;;  %s154_s30 = scalar_lea.sflag (!%p568_p3), [#allocation6], %s153_s27 }
  0x29   : > { %s157_s6 = scalar_lea.vmem (!%p568_p3), [#allocation5], %s618_s29 }
  0x2c   : > { %487 = dma.done.wait (%p591_p11), %s154_s30, 128  }
  0x2d   : > { %489 = vsyncadd (%p591_p11), %s154_s30, 4294967168 }
  0x2e   : > { %491 = dma.done.wait (%p46_p1), [#allocation8], 256  }
  0x2f   : > { %493 = vsyncadd (%p46_p1), [#allocation8], 4294967040  ;;  %p183_p3 = scmp.lt.s32.totalorder %s563_s22, 1  ;;  %s187_s23 = smul.u32 40, %s563_s22 }
  0x30   : > { %s637_s5 = smov 0  }
  0x31   : > { %s184_s7 = scalar_select %p183_p3, %s563_s22, 1 }
  0x33   : > { %s328_s8 = sshll.u32 %s184_s7, 3 }
  0x34   : > { %s635_s11 = scalar_lea.vmem %s668_s3, %s328_s8 }
  0x35 LB: >> { %s194_s12 = smul.u32 5, %s512_s5  ;;  %vm221_vm0 = vcmask 253952   ;;  %s220_s9 = scalar_lea.vmem [#allocation2], %s512_s5  ;;  %s512_s5 = sphi %s637_s5, %s193_s5  }
  0x36   : >> { %s193_s5 = sadd.s32 1, %s512_s5  }
  0x37   : >> { %s195_s13 = sadd.s32 %s194_s12, %s187_s23  ;;  %p190_p1 = scmp.ge.s32.totalorder %s193_s5, 8  }
  0x38   : >> { %s196_s14 = sld [smem:[#allocation4 + %s195_s13]]  ;;  %s200_s15 = sadd.s32 1, %s195_s13  ;;  %v224_v10 = vld [vmem:[%s157_s6] sm:$0xff] (%p190_p1)  ;;  %vm226_vm1 = vcmask (%p190_p1), 261120   ;;  %vm231_vm2 = vcmask (%p190_p1), 7168  }
  0x39   : >> { %s201_s16 = sld [smem:[#allocation4 + %s200_s15]]  ;;  %s205_s0 = sadd.s32 2, %s195_s13 }
  0x3a   : >> { %s206_s20 = sld [smem:[#allocation4 + %s205_s0]]  ;;  %s210_s19 = sadd.s32 3, %s195_s13 }
  0x3b   : >> { %s211_s21 = sld [smem:[#allocation4 + %s210_s19]]  ;;  %s215_s24 = sadd.s32 4, %s195_s13 }
  0x3c   : >> { %s216_s25 = sld [smem:[#allocation4 + %s215_s24]] }
  0x3e   : >> { %s197_s26 = scalar_lea.vmem [#allocation7], %s196_s14 }
  0x3f   : >> { %v198_v0 = vld [vmem:[%s197_s26] sm:$0x1]  ;;  %s202_s27 = scalar_lea.vmem [#allocation7], %s201_s16 }
  0x40   : >> { %v203_v1 = vld [vmem:[%s202_s27] sm:$0x1]  ;;  %s207_s30 = scalar_lea.vmem [#allocation7], %s206_s20 }
  0x41   : >> { %v204_v2 = vadd.f32 %v203_v1, %v198_v0  ;;  %v208_v3 = vld [vmem:[%s207_s30] sm:$0x1]  ;;  %s212_s7 = scalar_lea.vmem [#allocation7], %s211_s21 }
  0x42   : >> { %v213_v4 = vld [vmem:[%s212_s7] sm:$0x1]  ;;  %s217_s8 = scalar_lea.vmem [#allocation7], %s216_s25 }
  0x43   : >> { %v209_v5 = vadd.f32 %v208_v3, %v204_v2  ;;  %v218_v6 = vld [vmem:[%s217_s8] sm:$0x1] }
  0x45   : >> { %v214_v7 = vadd.f32 %v213_v4, %v209_v5  ;;  %192 = sbr.rel (!%p190_p1) target bundleno = 53 (0x35), region = 85 }
  0x47   : >> { %v219_v8 = vadd.f32 %v218_v6, %v214_v7 }
  0x49   : >> { %222 = vst.msk [vmem:[%s220_s9] sm:$0x1] %vm221_vm0, %v219_v8 }
  0x50   : > { %v223_v9 = vld [vmem:[#allocation2] sm:$0xff] }
  0x51   : > { %v225_v11 = vmul.f32 %v224_v10, %v223_v9 }
  0x53   : > { %v227_v12 = vsel %vm226_vm1, %v225_v11, 0.0 }
  0x54   : > { %228 = vadd.xlane.f32.xlu0 %v227_v12 }
  0xc7   : > { %v229_v13 = vpop.xlane.xlu0 %228 }
  0xc8   : > { %v230_v14 = vmul.f32 0.2, %v229_v13 }
  0xca   : > { %232 = vst.msk [vmem:[%s635_s11] sm:$0xff] %vm231_vm2, %v230_v14 }
  0xcb PF: > { %p22_p10 = scmp.ge.s32.totalorder %s577_s28, 4   ;;  %s672_s16 = smov %s500_s17 }
  0xcc   : > { %s673_s17 = smov %s504_s18  ;;  %s674_s18 = smov %s587_s4 }
  0xcd   : > { %s675_s19 = smov %s577_s28  ;;  %24 = sbr.rel (!%p22_p10) target bundleno = 10 (0xa), region = 96 }
  0xd2   :  { %252 = vsyncpa [#allocation6], 1 }
  0xd3   :  { %254 = vsyncpa [#allocation6 + $0x1], 1 }
  0xd4   :  { %255 = vsyncpa [#allocation8], 1 }

</bundles_post_ra>
